<compile_context>
chip_gen: v7x
topology: tpu7x:2x2x1
jax: 0.10.0
libtpu: 0.0.40
codegen_flags: <defaults>
</compile_context>

<pallas_src>
import functools

import jax
import jax.numpy as jnp
from jax.experimental import pallas as pl
from jax.experimental.pallas import tpu as pltpu


# -----------------------------------------------------------------------------
# Kernel 1: the full gamma/beta chain (4 _Affine_ stages) fused into one call.
#   gamma = L2_g(relu(L1_g(cat(y, extra_w))));  beta analogously with extra_b.
#   The concat is folded into split matmuls: cat(y, e) @ W1 == y@W1[:C] + e@W1[C:]
# -----------------------------------------------------------------------------
_STAGE_KEYS = ("gw1", "gb1", "gw2", "gb2", "bw1", "bb1", "bw2", "bb2")


def _affine_chain_kernel(*refs):
    y_ref, ow_ref, ob_ref = refs[0], refs[1], refs[2]
    w_refs = refs[3:35]        # 4 stages x (gw1,gb1,gw2,gb2,bw1,bb1,bw2,bb2)
    out_refs = refs[35:]       # g0,b0,g1,b1,g2,b2,g3,b3

    y = y_ref[...]
    cond = y.shape[1]

    def mlp(extra, w1_ref, b1_ref, w2_ref, b2_ref):
        former = w1_ref.shape[0] - cond
        h = (jnp.dot(y, w1_ref[0:cond, :], preferred_element_type=jnp.float32)
             + jnp.dot(extra, w1_ref[cond:cond + former, :],
                       preferred_element_type=jnp.float32)
             + b1_ref[...])
        h = jnp.maximum(h, 0.0)                                   # ReLU
        return (jnp.dot(h, w2_ref[...], preferred_element_type=jnp.float32)
                + b2_ref[...])

    def stage(idx, extra_g, extra_b):
        p = w_refs[idx * 8:(idx + 1) * 8]
        return (mlp(extra_g, p[0], p[1], p[2], p[3]),
                mlp(extra_b, p[4], p[5], p[6], p[7]))

    g0, b0 = stage(0, ow_ref[...], ob_ref[...])    # fuse1.affine0
    g1, b1 = stage(1, g0, b0)                      # fuse1.affine1
    g2, b2 = stage(2, g1, b1)                      # fuse2.affine0
    g3, b3 = stage(3, g2, b2)                      # fuse2.affine1

    for ref, val in zip(out_refs, (g0, b0, g1, b1, g2, b2, g3, b3)):
        ref[...] = val


def _affine_chain(y, ow, ob, params):
    B = y.shape[0]
    in_ch = params["f1a0"]["gw2"].shape[1]
    out_ch = params["f2a1"]["gw2"].shape[1]
    flat_w = [params[s][k] for s in ("f1a0", "f1a1", "f2a0", "f2a1")
              for k in _STAGE_KEYS]
    vspec = pl.BlockSpec(memory_space=pltpu.MemorySpace.VMEM)
    out_shape = ([jax.ShapeDtypeStruct((B, in_ch), jnp.float32)] * 4
                 + [jax.ShapeDtypeStruct((B, out_ch), jnp.float32)] * 4)
    return pl.pallas_call(
        _affine_chain_kernel,
        out_shape=out_shape,
        in_specs=[vspec] * (3 + len(flat_w)),
        out_specs=[vspec] * 8,
    )(y, ow, ob, *flat_w)


# -----------------------------------------------------------------------------
# Kernel 2: the spatial hot path (modulation + LeakyReLU + two 3x3 convs +
#           1x1 shortcut + residual add) in the lane-dense (C, H*W) layout.
#   Gridded over batch (parallel) so each step works on one (C, H*W) map.
# -----------------------------------------------------------------------------
def _gblock_spatial_kernel(x_ref, g0_ref, b0_ref, g1_ref, b1_ref,
                           g2_ref, b2_ref, g3_ref, b3_ref,
                           c1w_ref, c1b_ref, c2w_ref, c2b_ref,
                           scw_ref, scb_ref, out_ref, *, H, W):
    HW = H * W
    Cin = x_ref.shape[1]
    Cout = out_ref.shape[1]
    slope = jnp.float32(0.2)

    def leaky(h):
        return jnp.where(h > 0, h, slope * h)

    def modulate(h, g_ref, b_ref):
        # h: (C, HW);  g/b blocks: (1, C, 1) -> (C, 1) broadcast along lanes.
        return h * g_ref[0] + b_ref[0]

    # Border-validity masks for the 9 conv taps (shared by both convs).  The
    # spatial dims are flattened on the lane axis, so SAME zero-padding is
    # emulated by masking out taps whose source pixel is outside the image.
    pos = jax.lax.broadcasted_iota(jnp.int32, (1, HW), 1)
    row = pos // W
    col = pos % W
    masks = {}
    for dy in (-1, 0, 1):
        rv = jnp.logical_and(row + dy >= 0, row + dy <= H - 1)
        for dx in (-1, 0, 1):
            cv = jnp.logical_and(col + dx >= 0, col + dx <= W - 1)
            masks[(dy, dx)] = jnp.logical_and(rv, cv)

    def lane_shift(h, s):
        # result[:, p] = h[:, (p + s) % HW]  (wrapped lanes are masked later)
        s = s % HW
        if s == 0:
            return h
        return jnp.concatenate([h[:, s:], h[:, :s]], axis=1)

    def conv3x3(h, w_ref, b_ref, cin, cout):
        # h: (cin, HW);  w_ref: (3, 3, cout, cin);  b_ref: (cout, 1)
        w = w_ref[...]
        acc = jnp.zeros((cout, HW), jnp.float32)
        for ky in range(3):
            dy = ky - 1
            for kx in range(3):
                dx = kx - 1
                shifted = lane_shift(h, dy * W + dx)
                if dy == 0 and dx == 0:
                    tap = shifted
                else:
                    tap = jnp.where(masks[(dy, dx)], shifted, 0.0)
                for ci in range(cin):
                    # (1, HW) * (cout, 1) -> (cout, HW) broadcast FMA
                    acc = acc + tap[ci:ci + 1, :] * w[ky, kx, :, ci:ci + 1]
        return acc + b_ref[...]

    x = x_ref[0]                                            # (Cin, HW)

    # residual path: fuse1 -> c1 -> fuse2 -> c2
    h = leaky(modulate(x, g0_ref, b0_ref))
    h = leaky(modulate(h, g1_ref, b1_ref))
    h = conv3x3(h, c1w_ref, c1b_ref, Cin, Cout)
    h = leaky(modulate(h, g2_ref, b2_ref))
    h = leaky(modulate(h, g3_ref, b3_ref))
    h = conv3x3(h, c2w_ref, c2b_ref, Cout, Cout)

    # shortcut: learnable 1x1 conv (in_ch != out_ch)
    scw = scw_ref[...]                                      # (Cout, Cin)
    sc = jnp.zeros((Cout, HW), jnp.float32)
    for ci in range(Cin):
        sc = sc + x[ci:ci + 1, :] * scw[:, ci:ci + 1]
    sc = sc + scb_ref[...]

    out_ref[0] = sc + h


def _gblock_spatial(x_flat, gb3d, params, H, W):
    B, Cin, HW = x_flat.shape
    Cout = params["c1w"].shape[-1]

    # Kernel-friendly weight layouts (tiny one-off transposes in the wrapper).
    c1w = jnp.transpose(params["c1w"], (0, 1, 3, 2))        # (3,3,Cout,Cin)
    c2w = jnp.transpose(params["c2w"], (0, 1, 3, 2))        # (3,3,Cout,Cout)
    scw = params["cscw"].T                                  # (Cout, Cin)
    c1b = params["c1b"].reshape(Cout, 1)
    c2b = params["c2b"].reshape(Cout, 1)
    scb = params["cscb"].reshape(Cout, 1)

    def full_spec(shape):
        nd = len(shape)
        return pl.BlockSpec(shape, lambda b, _nd=nd: (0,) * _nd)

    in_specs = [pl.BlockSpec((1, Cin, HW), lambda b: (b, 0, 0))]
    for g in gb3d:                                          # (B, C, 1) each
        C = g.shape[1]
        in_specs.append(pl.BlockSpec((1, C, 1), lambda b: (b, 0, 0)))
    in_specs += [full_spec(c1w.shape), full_spec(c1b.shape),
                 full_spec(c2w.shape), full_spec(c2b.shape),
                 full_spec(scw.shape), full_spec(scb.shape)]

    kernel = functools.partial(_gblock_spatial_kernel, H=H, W=W)
    return pl.pallas_call(
        kernel,
        out_shape=jax.ShapeDtypeStruct((B, Cout, HW), jnp.float32),
        grid=(B,),
        in_specs=in_specs,
        out_specs=pl.BlockSpec((1, Cout, HW), lambda b: (b, 0, 0)),
        compiler_params=pltpu.CompilerParams(
            dimension_semantics=("parallel",)),
    )(x_flat, *gb3d, c1w, c1b, c2w, c2b, scw, scb)


# -----------------------------------------------------------------------------
# Full G_Block forward (wrapper glue: nearest upsample, flattening, wb concat)
# -----------------------------------------------------------------------------
def g_block_forward(params, x_nchw, y, overlay, upsample=True):
    # x_nchw: (B, in_ch, H, W)   y: (B, cond_dim)   overlay: (2B, former_dim)
    x = x_nchw.astype(jnp.float32)
    if upsample:
        # F.interpolate(scale_factor=2), default mode='nearest'
        # TODO(synk): fold the nearest-upsample duplication into the spatial
        # kernel to avoid the 4x HBM round-trip at larger shapes.
        x = jnp.repeat(jnp.repeat(x, 2, axis=2), 2, axis=3)
    B, Cin, H, W = x.shape
    half = overlay.shape[0] // 2
    ow, ob = overlay[:half], overlay[half:]

    # Single fused kernel for the whole gamma/beta chain.
    g0, b0, g1, b1, g2, b2, g3, b3 = _affine_chain(y, ow, ob, params)
    wb = jnp.concatenate([g3, b3], axis=0)                  # (2B, out_ch)

    x_flat = x.reshape(B, Cin, H * W)
    gb3d = [v.reshape(B, v.shape[1], 1)
            for v in (g0, b0, g1, b1, g2, b2, g3, b3)]
    out_flat = _gblock_spatial(x_flat, gb3d, params, H, W)
    out = out_flat.reshape(B, out_flat.shape[1], H, W)      # already NCHW
    return out, wb


# -----------------------------------------------------------------------------
# Deterministic parameter construction.
# NOTE: the PyTorch module zero-inits fc_*.linear2 (so gamma == 1, beta == 0 at
# init); here we use small random weights so the full datapath is exercised.
# -----------------------------------------------------------------------------
def init_params(key, cond_dim, in_ch, out_ch, former_dim):
    keys = iter(jax.random.split(key, 64))

    def lin(in_d, out_d, scale=0.1):
        w = jax.random.normal(next(keys), (in_d, out_d), jnp.float32) * scale
        b = jax.random.normal(next(keys), (1, out_d), jnp.float32) * scale
        return w, b

    def affine_params(former, nf):
        gw1, gb1 = lin(cond_dim + former, nf)
        gw2, gb2 = lin(nf, nf)
        bw1, bb1 = lin(cond_dim + former, nf)
        bw2, bb2 = lin(nf, nf)
        return dict(gw1=gw1, gb1=gb1, gw2=gw2, gb2=gb2,
                    bw1=bw1, bb1=bb1, bw2=bw2, bb2=bb2)

    p = {}
    p["f1a0"] = affine_params(former_dim, in_ch)
    p["f1a1"] = affine_params(in_ch, in_ch)
    p["f2a0"] = affine_params(in_ch, out_ch)
    p["f2a1"] = affine_params(out_ch, out_ch)
    p["c1w"] = jax.random.normal(next(keys), (3, 3, in_ch, out_ch), jnp.float32) * 0.1
    p["c1b"] = jax.random.normal(next(keys), (1, out_ch), jnp.float32) * 0.1
    p["c2w"] = jax.random.normal(next(keys), (3, 3, out_ch, out_ch), jnp.float32) * 0.1
    p["c2b"] = jax.random.normal(next(keys), (1, out_ch), jnp.float32) * 0.1
    p["cscw"] = jax.random.normal(next(keys), (in_ch, out_ch), jnp.float32) * 0.1
    p["cscb"] = jax.random.normal(next(keys), (1, out_ch), jnp.float32) * 0.1
    return p


# -----------------------------------------------------------------------------
# Pure-JAX reference (mirrors the PyTorch forward) for correctness checking.
# -----------------------------------------------------------------------------
def reference_forward(params, x_nchw, y, overlay, upsample=True):
    x = jnp.transpose(x_nchw, (0, 2, 3, 1)).astype(jnp.float32)
    if upsample:
        x = jnp.repeat(jnp.repeat(x, 2, axis=1), 2, axis=2)
    half = overlay.shape[0] // 2
    ow, ob = overlay[:half], overlay[half:]

    def affine(p, extra_w, extra_b):
        def mlp(w1, b1, w2, b2, extra):
            z = jnp.concatenate([y, extra], axis=1)
            h = jnp.maximum(z @ w1 + b1[0], 0.0)
            return h @ w2 + b2[0]
        g = mlp(p["gw1"], p["gb1"], p["gw2"], p["gb2"], extra_w)
        b = mlp(p["bw1"], p["bb1"], p["bw2"], p["bb2"], extra_b)
        return g, b

    def leaky(h):
        return jnp.where(h > 0, h, 0.2 * h)

    def conv3(h, w, b):
        return jax.lax.conv_general_dilated(
            h, w, (1, 1), "SAME",
            dimension_numbers=("NHWC", "HWIO", "NHWC")) + b[0]

    g0, b0 = affine(params["f1a0"], ow, ob)
    h = leaky(g0[:, None, None, :] * x + b0[:, None, None, :])
    g1, b1 = affine(params["f1a1"], g0, b0)
    h = leaky(g1[:, None, None, :] * h + b1[:, None, None, :])
    h = conv3(h, params["c1w"], params["c1b"])
    g2, b2 = affine(params["f2a0"], g1, b1)
    h = leaky(g2[:, None, None, :] * h + b2[:, None, None, :])
    g3, b3 = affine(params["f2a1"], g2, b2)
    h = leaky(g3[:, None, None, :] * h + b3[:, None, None, :])
    h = conv3(h, params["c2w"], params["c2b"])
    sc = jnp.einsum("bhwc,cd->bhwd", x, params["cscw"]) + params["cscb"][0]
    out = sc + h
    wb = jnp.concatenate([g3, b3], axis=0)
    return jnp.transpose(out, (0, 3, 1, 2)), wb


if __name__ == "__main__":
    B, in_ch, out_ch = 2, 4, 8
    H = W = 16
    cond_dim, former_dim = 16, 8
    upsample = True

    key = jax.random.PRNGKey(0)
    kx, ky, ko, kp = jax.random.split(key, 4)
    x = jax.random.normal(kx, (B, in_ch, H, W), jnp.float32)      # NCHW like PyTorch
    y = jax.random.normal(ky, (B, cond_dim), jnp.float32)
    overlay = jax.random.normal(ko, (2 * B, former_dim), jnp.float32)
    params = init_params(kp, cond_dim, in_ch, out_ch, former_dim)

    out, wb = g_block_forward(params, x, y, overlay, upsample=upsample)
    jax.block_until_ready((out, wb))

    out_r, wb_r = reference_forward(params, x, y, overlay, upsample=upsample)
    assert out.shape == (B, out_ch, 2 * H, 2 * W), out.shape
    assert wb.shape == (2 * B, out_ch), wb.shape
    assert jnp.allclose(out, out_r, atol=1e-3, rtol=1e-3), \
        float(jnp.max(jnp.abs(out - out_r)))
    assert jnp.allclose(wb, wb_r, atol=1e-3, rtol=1e-3), \
        float(jnp.max(jnp.abs(wb - wb_r)))
    print("KERNEL_OK")
</pallas_src>

<mosaic_0001>
module attributes {stable_mosaic.version = 11 : i64} {
  func.func @_affine_chain_kernel(%arg0: memref<2x16xf32, #tpu.memory_space<vmem>>, %arg1: memref<2x8xf32, #tpu.memory_space<vmem>>, %arg2: memref<2x8xf32, #tpu.memory_space<vmem>>, %arg3: memref<24x4xf32, #tpu.memory_space<vmem>>, %arg4: memref<1x4xf32, #tpu.memory_space<vmem>>, %arg5: memref<4x4xf32, #tpu.memory_space<vmem>>, %arg6: memref<1x4xf32, #tpu.memory_space<vmem>>, %arg7: memref<24x4xf32, #tpu.memory_space<vmem>>, %arg8: memref<1x4xf32, #tpu.memory_space<vmem>>, %arg9: memref<4x4xf32, #tpu.memory_space<vmem>>, %arg10: memref<1x4xf32, #tpu.memory_space<vmem>>, %arg11: memref<20x4xf32, #tpu.memory_space<vmem>>, %arg12: memref<1x4xf32, #tpu.memory_space<vmem>>, %arg13: memref<4x4xf32, #tpu.memory_space<vmem>>, %arg14: memref<1x4xf32, #tpu.memory_space<vmem>>, %arg15: memref<20x4xf32, #tpu.memory_space<vmem>>, %arg16: memref<1x4xf32, #tpu.memory_space<vmem>>, %arg17: memref<4x4xf32, #tpu.memory_space<vmem>>, %arg18: memref<1x4xf32, #tpu.memory_space<vmem>>, %arg19: memref<20x8xf32, #tpu.memory_space<vmem>>, %arg20: memref<1x8xf32, #tpu.memory_space<vmem>>, %arg21: memref<8x8xf32, #tpu.memory_space<vmem>>, %arg22: memref<1x8xf32, #tpu.memory_space<vmem>>, %arg23: memref<20x8xf32, #tpu.memory_space<vmem>>, %arg24: memref<1x8xf32, #tpu.memory_space<vmem>>, %arg25: memref<8x8xf32, #tpu.memory_space<vmem>>, %arg26: memref<1x8xf32, #tpu.memory_space<vmem>>, %arg27: memref<24x8xf32, #tpu.memory_space<vmem>>, %arg28: memref<1x8xf32, #tpu.memory_space<vmem>>, %arg29: memref<8x8xf32, #tpu.memory_space<vmem>>, %arg30: memref<1x8xf32, #tpu.memory_space<vmem>>, %arg31: memref<24x8xf32, #tpu.memory_space<vmem>>, %arg32: memref<1x8xf32, #tpu.memory_space<vmem>>, %arg33: memref<8x8xf32, #tpu.memory_space<vmem>>, %arg34: memref<1x8xf32, #tpu.memory_space<vmem>>, %arg35: memref<2x4xf32, #tpu.memory_space<vmem>>, %arg36: memref<2x4xf32, #tpu.memory_space<vmem>>, %arg37: memref<2x4xf32, #tpu.memory_space<vmem>>, %arg38: memref<2x4xf32, #tpu.memory_space<vmem>>, %arg39: memref<2x8xf32, #tpu.memory_space<vmem>>, %arg40: memref<2x8xf32, #tpu.memory_space<vmem>>, %arg41: memref<2x8xf32, #tpu.memory_space<vmem>>, %arg42: memref<2x8xf32, #tpu.memory_space<vmem>>) attributes {dimension_semantics = [], scalar_prefetch = 0 : i64, scratch_operands = 0 : i64, tpu.core_type = #tpu.core_type<tc>} {
    %c0 = arith.constant 0 : index
    %c0_0 = arith.constant 0 : index
    %0 = vector.load %arg0[%c0, %c0_0] : memref<2x16xf32, #tpu.memory_space<vmem>>, vector<2x16xf32>
    %c0_1 = arith.constant 0 : index
    %c0_2 = arith.constant 0 : index
    %1 = vector.load %arg1[%c0_1, %c0_2] : memref<2x8xf32, #tpu.memory_space<vmem>>, vector<2x8xf32>
    %c0_3 = arith.constant 0 : index
    %c0_4 = arith.constant 0 : index
    %2 = vector.load %arg2[%c0_3, %c0_4] : memref<2x8xf32, #tpu.memory_space<vmem>>, vector<2x8xf32>
    %c0_5 = arith.constant 0 : index
    %c0_6 = arith.constant 0 : index
    %3 = vector.load %arg3[%c0_5, %c0_6] : memref<24x4xf32, #tpu.memory_space<vmem>>, vector<16x4xf32>
    %cst = arith.constant dense<0.000000e+00> : vector<2x4xf32>
    %4 = tpu.matmul %0, %3, %cst {dimension_numbers = #tpu.dot_dimension_numbers<[1], [0], [0], [1], [0, 0, 1, 1], [], []>} : vector<2x16xf32>, vector<16x4xf32>, vector<2x4xf32> -> vector<2x4xf32>
    %c16 = arith.constant 16 : index
    %c0_7 = arith.constant 0 : index
    %5 = vector.load %arg3[%c16, %c0_7] : memref<24x4xf32, #tpu.memory_space<vmem>>, vector<8x4xf32>
    %cst_8 = arith.constant dense<0.000000e+00> : vector<2x4xf32>
    %6 = tpu.matmul %1, %5, %cst_8 {dimension_numbers = #tpu.dot_dimension_numbers<[1], [0], [0], [1], [0, 0, 1, 1], [], []>} : vector<2x8xf32>, vector<8x4xf32>, vector<2x4xf32> -> vector<2x4xf32>
    %7 = arith.addf %4, %6 : vector<2x4xf32>
    %c0_9 = arith.constant 0 : index
    %c0_10 = arith.constant 0 : index
    %8 = vector.load %arg4[%c0_9, %c0_10] : memref<1x4xf32, #tpu.memory_space<vmem>>, vector<1x4xf32>
    %9 = vector.broadcast %8 : vector<1x4xf32> to vector<2x4xf32>
    %10 = arith.addf %7, %9 : vector<2x4xf32>
    %cst_11 = arith.constant 0.000000e+00 : f32
    %11 = vector.broadcast %cst_11 : f32 to vector<2x4xf32>
    %12 = arith.maximumf %10, %11 : vector<2x4xf32>
    %c0_12 = arith.constant 0 : index
    %c0_13 = arith.constant 0 : index
    %13 = vector.load %arg5[%c0_12, %c0_13] : memref<4x4xf32, #tpu.memory_space<vmem>>, vector<4x4xf32>
    %cst_14 = arith.constant dense<0.000000e+00> : vector<2x4xf32>
    %14 = tpu.matmul %12, %13, %cst_14 {dimension_numbers = #tpu.dot_dimension_numbers<[1], [0], [0], [1], [0, 0, 1, 1], [], []>} : vector<2x4xf32>, vector<4x4xf32>, vector<2x4xf32> -> vector<2x4xf32>
    %c0_15 = arith.constant 0 : index
    %c0_16 = arith.constant 0 : index
    %15 = vector.load %arg6[%c0_15, %c0_16] : memref<1x4xf32, #tpu.memory_space<vmem>>, vector<1x4xf32>
    %16 = vector.broadcast %15 : vector<1x4xf32> to vector<2x4xf32>
    %17 = arith.addf %14, %16 : vector<2x4xf32>
    %c0_17 = arith.constant 0 : index
    %c0_18 = arith.constant 0 : index
    %18 = vector.load %arg7[%c0_17, %c0_18] : memref<24x4xf32, #tpu.memory_space<vmem>>, vector<16x4xf32>
    %cst_19 = arith.constant dense<0.000000e+00> : vector<2x4xf32>
    %19 = tpu.matmul %0, %18, %cst_19 {dimension_numbers = #tpu.dot_dimension_numbers<[1], [0], [0], [1], [0, 0, 1, 1], [], []>} : vector<2x16xf32>, vector<16x4xf32>, vector<2x4xf32> -> vector<2x4xf32>
    %c16_20 = arith.constant 16 : index
    %c0_21 = arith.constant 0 : index
    %20 = vector.load %arg7[%c16_20, %c0_21] : memref<24x4xf32, #tpu.memory_space<vmem>>, vector<8x4xf32>
    %cst_22 = arith.constant dense<0.000000e+00> : vector<2x4xf32>
    %21 = tpu.matmul %2, %20, %cst_22 {dimension_numbers = #tpu.dot_dimension_numbers<[1], [0], [0], [1], [0, 0, 1, 1], [], []>} : vector<2x8xf32>, vector<8x4xf32>, vector<2x4xf32> -> vector<2x4xf32>
    %22 = arith.addf %19, %21 : vector<2x4xf32>
    %c0_23 = arith.constant 0 : index
    %c0_24 = arith.constant 0 : index
    %23 = vector.load %arg8[%c0_23, %c0_24] : memref<1x4xf32, #tpu.memory_space<vmem>>, vector<1x4xf32>
    %24 = vector.broadcast %23 : vector<1x4xf32> to vector<2x4xf32>
    %25 = arith.addf %22, %24 : vector<2x4xf32>
    %cst_25 = arith.constant 0.000000e+00 : f32
    %26 = vector.broadcast %cst_25 : f32 to vector<2x4xf32>
    %27 = arith.maximumf %25, %26 : vector<2x4xf32>
    %c0_26 = arith.constant 0 : index
    %c0_27 = arith.constant 0 : index
    %28 = vector.load %arg9[%c0_26, %c0_27] : memref<4x4xf32, #tpu.memory_space<vmem>>, vector<4x4xf32>
    %cst_28 = arith.constant dense<0.000000e+00> : vector<2x4xf32>
    %29 = tpu.matmul %27, %28, %cst_28 {dimension_numbers = #tpu.dot_dimension_numbers<[1], [0], [0], [1], [0, 0, 1, 1], [], []>} : vector<2x4xf32>, vector<4x4xf32>, vector<2x4xf32> -> vector<2x4xf32>
    %c0_29 = arith.constant 0 : index
    %c0_30 = arith.constant 0 : index
    %30 = vector.load %arg10[%c0_29, %c0_30] : memref<1x4xf32, #tpu.memory_space<vmem>>, vector<1x4xf32>
    %31 = vector.broadcast %30 : vector<1x4xf32> to vector<2x4xf32>
    %32 = arith.addf %29, %31 : vector<2x4xf32>
    %c0_31 = arith.constant 0 : index
    %c0_32 = arith.constant 0 : index
    %33 = vector.load %arg11[%c0_31, %c0_32] : memref<20x4xf32, #tpu.memory_space<vmem>>, vector<16x4xf32>
    %cst_33 = arith.constant dense<0.000000e+00> : vector<2x4xf32>
    %34 = tpu.matmul %0, %33, %cst_33 {dimension_numbers = #tpu.dot_dimension_numbers<[1], [0], [0], [1], [0, 0, 1, 1], [], []>} : vector<2x16xf32>, vector<16x4xf32>, vector<2x4xf32> -> vector<2x4xf32>
    %c16_34 = arith.constant 16 : index
    %c0_35 = arith.constant 0 : index
    %35 = vector.load %arg11[%c16_34, %c0_35] : memref<20x4xf32, #tpu.memory_space<vmem>>, vector<4x4xf32>
    %cst_36 = arith.constant dense<0.000000e+00> : vector<2x4xf32>
    %36 = tpu.matmul %17, %35, %cst_36 {dimension_numbers = #tpu.dot_dimension_numbers<[1], [0], [0], [1], [0, 0, 1, 1], [], []>} : vector<2x4xf32>, vector<4x4xf32>, vector<2x4xf32> -> vector<2x4xf32>
    %37 = arith.addf %34, %36 : vector<2x4xf32>
    %c0_37 = arith.constant 0 : index
    %c0_38 = arith.constant 0 : index
    %38 = vector.load %arg12[%c0_37, %c0_38] : memref<1x4xf32, #tpu.memory_space<vmem>>, vector<1x4xf32>
    %39 = vector.broadcast %38 : vector<1x4xf32> to vector<2x4xf32>
    %40 = arith.addf %37, %39 : vector<2x4xf32>
    %cst_39 = arith.constant 0.000000e+00 : f32
    %41 = vector.broadcast %cst_39 : f32 to vector<2x4xf32>
    %42 = arith.maximumf %40, %41 : vector<2x4xf32>
    %c0_40 = arith.constant 0 : index
    %c0_41 = arith.constant 0 : index
    %43 = vector.load %arg13[%c0_40, %c0_41] : memref<4x4xf32, #tpu.memory_space<vmem>>, vector<4x4xf32>
    %cst_42 = arith.constant dense<0.000000e+00> : vector<2x4xf32>
    %44 = tpu.matmul %42, %43, %cst_42 {dimension_numbers = #tpu.dot_dimension_numbers<[1], [0], [0], [1], [0, 0, 1, 1], [], []>} : vector<2x4xf32>, vector<4x4xf32>, vector<2x4xf32> -> vector<2x4xf32>
    %c0_43 = arith.constant 0 : index
    %c0_44 = arith.constant 0 : index
    %45 = vector.load %arg14[%c0_43, %c0_44] : memref<1x4xf32, #tpu.memory_space<vmem>>, vector<1x4xf32>
    %46 = vector.broadcast %45 : vector<1x4xf32> to vector<2x4xf32>
    %47 = arith.addf %44, %46 : vector<2x4xf32>
    %c0_45 = arith.constant 0 : index
    %c0_46 = arith.constant 0 : index
    %48 = vector.load %arg15[%c0_45, %c0_46] : memref<20x4xf32, #tpu.memory_space<vmem>>, vector<16x4xf32>
    %cst_47 = arith.constant dense<0.000000e+00> : vector<2x4xf32>
    %49 = tpu.matmul %0, %48, %cst_47 {dimension_numbers = #tpu.dot_dimension_numbers<[1], [0], [0], [1], [0, 0, 1, 1], [], []>} : vector<2x16xf32>, vector<16x4xf32>, vector<2x4xf32> -> vector<2x4xf32>
    %c16_48 = arith.constant 16 : index
    %c0_49 = arith.constant 0 : index
    %50 = vector.load %arg15[%c16_48, %c0_49] : memref<20x4xf32, #tpu.memory_space<vmem>>, vector<4x4xf32>
    %cst_50 = arith.constant dense<0.000000e+00> : vector<2x4xf32>
    %51 = tpu.matmul %32, %50, %cst_50 {dimension_numbers = #tpu.dot_dimension_numbers<[1], [0], [0], [1], [0, 0, 1, 1], [], []>} : vector<2x4xf32>, vector<4x4xf32>, vector<2x4xf32> -> vector<2x4xf32>
    %52 = arith.addf %49, %51 : vector<2x4xf32>
    %c0_51 = arith.constant 0 : index
    %c0_52 = arith.constant 0 : index
    %53 = vector.load %arg16[%c0_51, %c0_52] : memref<1x4xf32, #tpu.memory_space<vmem>>, vector<1x4xf32>
    %54 = vector.broadcast %53 : vector<1x4xf32> to vector<2x4xf32>
    %55 = arith.addf %52, %54 : vector<2x4xf32>
    %cst_53 = arith.constant 0.000000e+00 : f32
    %56 = vector.broadcast %cst_53 : f32 to vector<2x4xf32>
    %57 = arith.maximumf %55, %56 : vector<2x4xf32>
    %c0_54 = arith.constant 0 : index
    %c0_55 = arith.constant 0 : index
    %58 = vector.load %arg17[%c0_54, %c0_55] : memref<4x4xf32, #tpu.memory_space<vmem>>, vector<4x4xf32>
    %cst_56 = arith.constant dense<0.000000e+00> : vector<2x4xf32>
    %59 = tpu.matmul %57, %58, %cst_56 {dimension_numbers = #tpu.dot_dimension_numbers<[1], [0], [0], [1], [0, 0, 1, 1], [], []>} : vector<2x4xf32>, vector<4x4xf32>, vector<2x4xf32> -> vector<2x4xf32>
    %c0_57 = arith.constant 0 : index
    %c0_58 = arith.constant 0 : index
    %60 = vector.load %arg18[%c0_57, %c0_58] : memref<1x4xf32, #tpu.memory_space<vmem>>, vector<1x4xf32>
    %61 = vector.broadcast %60 : vector<1x4xf32> to vector<2x4xf32>
    %62 = arith.addf %59, %61 : vector<2x4xf32>
    %c0_59 = arith.constant 0 : index
    %c0_60 = arith.constant 0 : index
    %63 = vector.load %arg19[%c0_59, %c0_60] : memref<20x8xf32, #tpu.memory_space<vmem>>, vector<16x8xf32>
    %cst_61 = arith.constant dense<0.000000e+00> : vector<2x8xf32>
    %64 = tpu.matmul %0, %63, %cst_61 {dimension_numbers = #tpu.dot_dimension_numbers<[1], [0], [0], [1], [0, 0, 1, 1], [], []>} : vector<2x16xf32>, vector<16x8xf32>, vector<2x8xf32> -> vector<2x8xf32>
    %c16_62 = arith.constant 16 : index
    %c0_63 = arith.constant 0 : index
    %65 = vector.load %arg19[%c16_62, %c0_63] : memref<20x8xf32, #tpu.memory_space<vmem>>, vector<4x8xf32>
    %cst_64 = arith.constant dense<0.000000e+00> : vector<2x8xf32>
    %66 = tpu.matmul %47, %65, %cst_64 {dimension_numbers = #tpu.dot_dimension_numbers<[1], [0], [0], [1], [0, 0, 1, 1], [], []>} : vector<2x4xf32>, vector<4x8xf32>, vector<2x8xf32> -> vector<2x8xf32>
    %67 = arith.addf %64, %66 : vector<2x8xf32>
    %c0_65 = arith.constant 0 : index
    %c0_66 = arith.constant 0 : index
    %68 = vector.load %arg20[%c0_65, %c0_66] : memref<1x8xf32, #tpu.memory_space<vmem>>, vector<1x8xf32>
    %69 = vector.broadcast %68 : vector<1x8xf32> to vector<2x8xf32>
    %70 = arith.addf %67, %69 : vector<2x8xf32>
    %cst_67 = arith.constant 0.000000e+00 : f32
    %71 = vector.broadcast %cst_67 : f32 to vector<2x8xf32>
    %72 = arith.maximumf %70, %71 : vector<2x8xf32>
    %c0_68 = arith.constant 0 : index
    %c0_69 = arith.constant 0 : index
    %73 = vector.load %arg21[%c0_68, %c0_69] : memref<8x8xf32, #tpu.memory_space<vmem>>, vector<8x8xf32>
    %cst_70 = arith.constant dense<0.000000e+00> : vector<2x8xf32>
    %74 = tpu.matmul %72, %73, %cst_70 {dimension_numbers = #tpu.dot_dimension_numbers<[1], [0], [0], [1], [0, 0, 1, 1], [], []>} : vector<2x8xf32>, vector<8x8xf32>, vector<2x8xf32> -> vector<2x8xf32>
    %c0_71 = arith.constant 0 : index
    %c0_72 = arith.constant 0 : index
    %75 = vector.load %arg22[%c0_71, %c0_72] : memref<1x8xf32, #tpu.memory_space<vmem>>, vector<1x8xf32>
    %76 = vector.broadcast %75 : vector<1x8xf32> to vector<2x8xf32>
    %77 = arith.addf %74, %76 : vector<2x8xf32>
    %c0_73 = arith.constant 0 : index
    %c0_74 = arith.constant 0 : index
    %78 = vector.load %arg23[%c0_73, %c0_74] : memref<20x8xf32, #tpu.memory_space<vmem>>, vector<16x8xf32>
    %cst_75 = arith.constant dense<0.000000e+00> : vector<2x8xf32>
    %79 = tpu.matmul %0, %78, %cst_75 {dimension_numbers = #tpu.dot_dimension_numbers<[1], [0], [0], [1], [0, 0, 1, 1], [], []>} : vector<2x16xf32>, vector<16x8xf32>, vector<2x8xf32> -> vector<2x8xf32>
    %c16_76 = arith.constant 16 : index
    %c0_77 = arith.constant 0 : index
    %80 = vector.load %arg23[%c16_76, %c0_77] : memref<20x8xf32, #tpu.memory_space<vmem>>, vector<4x8xf32>
    %cst_78 = arith.constant dense<0.000000e+00> : vector<2x8xf32>
    %81 = tpu.matmul %62, %80, %cst_78 {dimension_numbers = #tpu.dot_dimension_numbers<[1], [0], [0], [1], [0, 0, 1, 1], [], []>} : vector<2x4xf32>, vector<4x8xf32>, vector<2x8xf32> -> vector<2x8xf32>
    %82 = arith.addf %79, %81 : vector<2x8xf32>
    %c0_79 = arith.constant 0 : index
    %c0_80 = arith.constant 0 : index
    %83 = vector.load %arg24[%c0_79, %c0_80] : memref<1x8xf32, #tpu.memory_space<vmem>>, vector<1x8xf32>
    %84 = vector.broadcast %83 : vector<1x8xf32> to vector<2x8xf32>
    %85 = arith.addf %82, %84 : vector<2x8xf32>
    %cst_81 = arith.constant 0.000000e+00 : f32
    %86 = vector.broadcast %cst_81 : f32 to vector<2x8xf32>
    %87 = arith.maximumf %85, %86 : vector<2x8xf32>
    %c0_82 = arith.constant 0 : index
    %c0_83 = arith.constant 0 : index
    %88 = vector.load %arg25[%c0_82, %c0_83] : memref<8x8xf32, #tpu.memory_space<vmem>>, vector<8x8xf32>
    %cst_84 = arith.constant dense<0.000000e+00> : vector<2x8xf32>
    %89 = tpu.matmul %87, %88, %cst_84 {dimension_numbers = #tpu.dot_dimension_numbers<[1], [0], [0], [1], [0, 0, 1, 1], [], []>} : vector<2x8xf32>, vector<8x8xf32>, vector<2x8xf32> -> vector<2x8xf32>
    %c0_85 = arith.constant 0 : index
    %c0_86 = arith.constant 0 : index
    %90 = vector.load %arg26[%c0_85, %c0_86] : memref<1x8xf32, #tpu.memory_space<vmem>>, vector<1x8xf32>
    %91 = vector.broadcast %90 : vector<1x8xf32> to vector<2x8xf32>
    %92 = arith.addf %89, %91 : vector<2x8xf32>
    %c0_87 = arith.constant 0 : index
    %c0_88 = arith.constant 0 : index
    %93 = vector.load %arg27[%c0_87, %c0_88] : memref<24x8xf32, #tpu.memory_space<vmem>>, vector<16x8xf32>
    %cst_89 = arith.constant dense<0.000000e+00> : vector<2x8xf32>
    %94 = tpu.matmul %0, %93, %cst_89 {dimension_numbers = #tpu.dot_dimension_numbers<[1], [0], [0], [1], [0, 0, 1, 1], [], []>} : vector<2x16xf32>, vector<16x8xf32>, vector<2x8xf32> -> vector<2x8xf32>
    %c16_90 = arith.constant 16 : index
    %c0_91 = arith.constant 0 : index
    %95 = vector.load %arg27[%c16_90, %c0_91] : memref<24x8xf32, #tpu.memory_space<vmem>>, vector<8x8xf32>
    %cst_92 = arith.constant dense<0.000000e+00> : vector<2x8xf32>
    %96 = tpu.matmul %77, %95, %cst_92 {dimension_numbers = #tpu.dot_dimension_numbers<[1], [0], [0], [1], [0, 0, 1, 1], [], []>} : vector<2x8xf32>, vector<8x8xf32>, vector<2x8xf32> -> vector<2x8xf32>
    %97 = arith.addf %94, %96 : vector<2x8xf32>
    %c0_93 = arith.constant 0 : index
    %c0_94 = arith.constant 0 : index
    %98 = vector.load %arg28[%c0_93, %c0_94] : memref<1x8xf32, #tpu.memory_space<vmem>>, vector<1x8xf32>
    %99 = vector.broadcast %98 : vector<1x8xf32> to vector<2x8xf32>
    %100 = arith.addf %97, %99 : vector<2x8xf32>
    %cst_95 = arith.constant 0.000000e+00 : f32
    %101 = vector.broadcast %cst_95 : f32 to vector<2x8xf32>
    %102 = arith.maximumf %100, %101 : vector<2x8xf32>
    %c0_96 = arith.constant 0 : index
    %c0_97 = arith.constant 0 : index
    %103 = vector.load %arg29[%c0_96, %c0_97] : memref<8x8xf32, #tpu.memory_space<vmem>>, vector<8x8xf32>
    %cst_98 = arith.constant dense<0.000000e+00> : vector<2x8xf32>
    %104 = tpu.matmul %102, %103, %cst_98 {dimension_numbers = #tpu.dot_dimension_numbers<[1], [0], [0], [1], [0, 0, 1, 1], [], []>} : vector<2x8xf32>, vector<8x8xf32>, vector<2x8xf32> -> vector<2x8xf32>
    %c0_99 = arith.constant 0 : index
    %c0_100 = arith.constant 0 : index
    %105 = vector.load %arg30[%c0_99, %c0_100] : memref<1x8xf32, #tpu.memory_space<vmem>>, vector<1x8xf32>
    %106 = vector.broadcast %105 : vector<1x8xf32> to vector<2x8xf32>
    %107 = arith.addf %104, %106 : vector<2x8xf32>
    %c0_101 = arith.constant 0 : index
    %c0_102 = arith.constant 0 : index
    %108 = vector.load %arg31[%c0_101, %c0_102] : memref<24x8xf32, #tpu.memory_space<vmem>>, vector<16x8xf32>
    %cst_103 = arith.constant dense<0.000000e+00> : vector<2x8xf32>
    %109 = tpu.matmul %0, %108, %cst_103 {dimension_numbers = #tpu.dot_dimension_numbers<[1], [0], [0], [1], [0, 0, 1, 1], [], []>} : vector<2x16xf32>, vector<16x8xf32>, vector<2x8xf32> -> vector<2x8xf32>
    %c16_104 = arith.constant 16 : index
    %c0_105 = arith.constant 0 : index
    %110 = vector.load %arg31[%c16_104, %c0_105] : memref<24x8xf32, #tpu.memory_space<vmem>>, vector<8x8xf32>
    %cst_106 = arith.constant dense<0.000000e+00> : vector<2x8xf32>
    %111 = tpu.matmul %92, %110, %cst_106 {dimension_numbers = #tpu.dot_dimension_numbers<[1], [0], [0], [1], [0, 0, 1, 1], [], []>} : vector<2x8xf32>, vector<8x8xf32>, vector<2x8xf32> -> vector<2x8xf32>
    %112 = arith.addf %109, %111 : vector<2x8xf32>
    %c0_107 = arith.constant 0 : index
    %c0_108 = arith.constant 0 : index
    %113 = vector.load %arg32[%c0_107, %c0_108] : memref<1x8xf32, #tpu.memory_space<vmem>>, vector<1x8xf32>
    %114 = vector.broadcast %113 : vector<1x8xf32> to vector<2x8xf32>
    %115 = arith.addf %112, %114 : vector<2x8xf32>
    %cst_109 = arith.constant 0.000000e+00 : f32
    %116 = vector.broadcast %cst_109 : f32 to vector<2x8xf32>
    %117 = arith.maximumf %115, %116 : vector<2x8xf32>
    %c0_110 = arith.constant 0 : index
    %c0_111 = arith.constant 0 : index
    %118 = vector.load %arg33[%c0_110, %c0_111] : memref<8x8xf32, #tpu.memory_space<vmem>>, vector<8x8xf32>
    %cst_112 = arith.constant dense<0.000000e+00> : vector<2x8xf32>
    %119 = tpu.matmul %117, %118, %cst_112 {dimension_numbers = #tpu.dot_dimension_numbers<[1], [0], [0], [1], [0, 0, 1, 1], [], []>} : vector<2x8xf32>, vector<8x8xf32>, vector<2x8xf32> -> vector<2x8xf32>
    %c0_113 = arith.constant 0 : index
    %c0_114 = arith.constant 0 : index
    %120 = vector.load %arg34[%c0_113, %c0_114] : memref<1x8xf32, #tpu.memory_space<vmem>>, vector<1x8xf32>
    %121 = vector.broadcast %120 : vector<1x8xf32> to vector<2x8xf32>
    %122 = arith.addf %119, %121 : vector<2x8xf32>
    %c0_115 = arith.constant 0 : index
    %c0_116 = arith.constant 0 : index
    %123 = vector.load %arg35[%c0_115, %c0_116] : memref<2x4xf32, #tpu.memory_space<vmem>>, vector<2x4xf32>
    tpu.vector_store %arg35[%c0_115, %c0_116], %17 {strides = array<i32>} : memref<2x4xf32, #tpu.memory_space<vmem>>, vector<2x4xf32>,
    %c0_117 = arith.constant 0 : index
    %c0_118 = arith.constant 0 : index
    %124 = vector.load %arg36[%c0_117, %c0_118] : memref<2x4xf32, #tpu.memory_space<vmem>>, vector<2x4xf32>
    tpu.vector_store %arg36[%c0_117, %c0_118], %32 {strides = array<i32>} : memref<2x4xf32, #tpu.memory_space<vmem>>, vector<2x4xf32>,
    %c0_119 = arith.constant 0 : index
    %c0_120 = arith.constant 0 : index
    %125 = vector.load %arg37[%c0_119, %c0_120] : memref<2x4xf32, #tpu.memory_space<vmem>>, vector<2x4xf32>
    tpu.vector_store %arg37[%c0_119, %c0_120], %47 {strides = array<i32>} : memref<2x4xf32, #tpu.memory_space<vmem>>, vector<2x4xf32>,
    %c0_121 = arith.constant 0 : index
    %c0_122 = arith.constant 0 : index
    %126 = vector.load %arg38[%c0_121, %c0_122] : memref<2x4xf32, #tpu.memory_space<vmem>>, vector<2x4xf32>
    tpu.vector_store %arg38[%c0_121, %c0_122], %62 {strides = array<i32>} : memref<2x4xf32, #tpu.memory_space<vmem>>, vector<2x4xf32>,
    %c0_123 = arith.constant 0 : index
    %c0_124 = arith.constant 0 : index
    %127 = vector.load %arg39[%c0_123, %c0_124] : memref<2x8xf32, #tpu.memory_space<vmem>>, vector<2x8xf32>
    tpu.vector_store %arg39[%c0_123, %c0_124], %77 {strides = array<i32>} : memref<2x8xf32, #tpu.memory_space<vmem>>, vector<2x8xf32>,
    %c0_125 = arith.constant 0 : index
    %c0_126 = arith.constant 0 : index
    %128 = vector.load %arg40[%c0_125, %c0_126] : memref<2x8xf32, #tpu.memory_space<vmem>>, vector<2x8xf32>
    tpu.vector_store %arg40[%c0_125, %c0_126], %92 {strides = array<i32>} : memref<2x8xf32, #tpu.memory_space<vmem>>, vector<2x8xf32>,
    %c0_127 = arith.constant 0 : index
    %c0_128 = arith.constant 0 : index
    %129 = vector.load %arg41[%c0_127, %c0_128] : memref<2x8xf32, #tpu.memory_space<vmem>>, vector<2x8xf32>
    tpu.vector_store %arg41[%c0_127, %c0_128], %107 {strides = array<i32>} : memref<2x8xf32, #tpu.memory_space<vmem>>, vector<2x8xf32>,
    %c0_129 = arith.constant 0 : index
    %c0_130 = arith.constant 0 : index
    %130 = vector.load %arg42[%c0_129, %c0_130] : memref<2x8xf32, #tpu.memory_space<vmem>>, vector<2x8xf32>
    tpu.vector_store %arg42[%c0_129, %c0_130], %122 {strides = array<i32>} : memref<2x8xf32, #tpu.memory_space<vmem>>, vector<2x8xf32>,
    return
  }
}

</mosaic_0001>

<bundles_post_ra>
// kernel: tpu_custom_call.1
= control target key start
LH: loop header
LB: loop body
LE: loop exit
PB: predicated region body
PF: predicated region fallthrough
CT: control target
= control target key end

     0   :  { %s2752_s6 = smov 1   ;;  %s2753_s10 = smov 2   ;;  %s3230_s0 = inlined_call_operand.smem [shape: u32[43], index: -1, kind: input, shape index: {}] }
   0x1   :  { %s2813_s5 = sld [smem:[%s3230_s0]]   ;;  %s2754_s14 = smov 3  }
   0x2   :  { %s2818_s9 = sld [smem:[%s3230_s0 + %s2752_s6]]   ;;  %s2755_s18 = smov 4  }
   0x3   :  { %s2823_s13 = sld [smem:[%s3230_s0 + %s2753_s10]]   ;;  %s2756_s22 = smov 5  }
   0x4   :  { %s2828_s17 = sld [smem:[%s3230_s0 + %s2754_s14]]   ;;  %s2757_s26 = smov 6  }
   0x5   :  { %s2833_s21 = sld [smem:[%s3230_s0 + %s2755_s18]]   ;;  %s2758_s30 = smov 7  }
   0x6   :  { %s2838_s25 = sld [smem:[%s3230_s0 + %s2756_s22]]   ;;  %s2759_s4 = smov 8  }
   0x7   :  { %s2843_s29 = sld [smem:[%s3230_s0 + %s2757_s26]]   ;;  %s2760_s10 = smov 9  }
   0x8   :  { %s2848_s3 = sld [smem:[%s3230_s0 + %s2758_s30]]   ;;  %s2761_s15 = smov 10  }
   0x9   :  { %s2853_s8 = sld [smem:[%s3230_s0 + %s2759_s4]]   ;;  %s2762_s20 = smov 11  }
   0xa   :  { %s2858_s14 = sld [smem:[%s3230_s0 + %s2760_s10]]   ;;  %s2763_s26 = smov 12  }
   0xb   :  { %s2863_s19 = sld [smem:[%s3230_s0 + %s2761_s15]]   ;;  %s2764_s1 = smov 13  }
   0xc   :  { %s2868_s24 = sld [smem:[%s3230_s0 + %s2762_s20]]   ;;  %s2765_s7 = smov 14  }
   0xd   :  { %s2873_s30 = sld [smem:[%s3230_s0 + %s2763_s26]]   ;;  %s2766_s15 = smov 15  }
   0xe   :  { %s2878_s6 = sld [smem:[%s3230_s0 + %s2764_s1]]   ;;  %s2767_s22 = smov 16  }
   0xf   :  { %s2883_s12 = sld [smem:[%s3230_s0 + %s2765_s7]]   ;;  %s2768_s28 = smov 17  }
  0x10   :  { %s2888_s20 = sld [smem:[%s3230_s0 + %s2766_s15]]   ;;  %s2769_s7 = smov 18  }
  0x11   :  { %s2893_s27 = sld [smem:[%s3230_s0 + %s2767_s22]]   ;;  %s2770_s15 = smov 19  }
  0x12   :  { %s2898_s4 = sld [smem:[%s3230_s0 + %s2768_s28]]   ;;  %s2771_s22 = smov 20  }
  0x13   :  { %3239 = sst [smem:[#allocation20_spill]] %s2873_s30  ;;  %s2772_s28 = smov 21  }
  0x14   :  { %s2908_s30 = sld [smem:[%s3230_s0 + %s2770_s15]]   ;;  %s2774_s15 = smov 23  }
  0x15   :  { %3240 = sst [smem:[#allocation21_spill]] %s2883_s12 }
  0x16   :  { %s2903_s12 = sld [smem:[%s3230_s0 + %s2769_s7]]   ;;  %s2773_s7 = smov 22  }
  0x17   :  { %3241 = sst [smem:[#allocation22_spill]] %s2893_s27 }
  0x18   :  { %3242 = sst [smem:[#allocation23_spill]] %s2898_s4 }
  0x19   :  { %s2913_s27 = sld [smem:[%s3230_s0 + %s2771_s22]]   ;;  %s2775_s22 = smov 24  }
  0x1a   :  { %3244 = sst [smem:[#allocation25_spill]] %s2908_s30 }
  0x1b   :  { %s2918_s4 = sld [smem:[%s3230_s0 + %s2772_s28]]   ;;  %s2776_s28 = smov 25  }
  0x1c   :  { %3243 = sst [smem:[#allocation24_spill]] %s2903_s12 }
  0x1d   :  { %s2923_s12 = sld [smem:[%s3230_s0 + %s2773_s7]]   ;;  %s2777_s7 = smov 26  }
  0x1e   :  { %s2928_s30 = sld [smem:[%s3230_s0 + %s2774_s15]]   ;;  %s2778_s15 = smov 27  }
  0x1f   :  { %3245 = sst [smem:[#allocation26_spill]] %s2913_s27 }
  0x20   :  { %s2933_s27 = sld [smem:[%s3230_s0 + %s2775_s22]]   ;;  %s2779_s22 = smov 28  }
  0x21   :  { %3246 = sst [smem:[#allocation27_spill]] %s2918_s4 }
  0x22   :  { %s2938_s4 = sld [smem:[%s3230_s0 + %s2776_s28]]   ;;  %s2780_s28 = smov 29  }
  0x23   :  { %3247 = sst [smem:[#allocation28_spill]] %s2923_s12 }
  0x24   :  { %3248 = sst [smem:[#allocation29_spill]] %s2928_s30 }
  0x25   :  { %s2943_s12 = sld [smem:[%s3230_s0 + %s2777_s7]]   ;;  %s2781_s7 = smov 30  }
  0x26   :  { %3249 = sst [smem:[#allocation30_spill]] %s2933_s27 }
  0x27   :  { %s2948_s30 = sld [smem:[%s3230_s0 + %s2778_s15]]   ;;  %s2782_s15 = smov 31  }
  0x28   :  { %3250 = sst [smem:[#allocation31_spill]] %s2938_s4 }
  0x29   :  { %s2953_s27 = sld [smem:[%s3230_s0 + %s2779_s22]]   ;;  %s2783_s22 = smov 32  }
  0x2a   :  { %s2958_s4 = sld [smem:[%s3230_s0 + %s2780_s28]]   ;;  %s2784_s28 = smov 33  }
  0x2b   :  { %3251 = sst [smem:[#allocation32_spill]] %s2943_s12 }
  0x2c   :  { %s2963_s12 = sld [smem:[%s3230_s0 + %s2781_s7]]   ;;  %s2785_s7 = smov 34  }
  0x2d   :  { %3252 = sst [smem:[#allocation33_spill]] %s2948_s30 }
  0x2e   :  { %s2968_s30 = sld [smem:[%s3230_s0 + %s2782_s15]]   ;;  %s2786_s15 = smov 35  }
  0x2f   :  { %3253 = sst [smem:[#allocation34_spill]] %s2953_s27 }
  0x30   :  { %3254 = sst [smem:[#allocation35_spill]] %s2958_s4 }
  0x31   :  { %s2973_s27 = sld [smem:[%s3230_s0 + %s2783_s22]]   ;;  %s2787_s22 = smov 36  }
  0x32   :  { %3255 = sst [smem:[#allocation36_spill]] %s2963_s12 }
  0x33   :  { %s2978_s4 = sld [smem:[%s3230_s0 + %s2784_s28]]   ;;  %s2788_s28 = smov 37  }
  0x34   :  { %3256 = sst [smem:[#allocation37_spill]] %s2968_s30 }
  0x35   :  { %s2983_s12 = sld [smem:[%s3230_s0 + %s2785_s7]]   ;;  %s2789_s7 = smov 38  }
  0x36   :  { %s2988_s30 = sld [smem:[%s3230_s0 + %s2786_s15]]   ;;  %s2790_s15 = smov 39  }
  0x37   :  { %3257 = sst [smem:[#allocation38_spill]] %s2973_s27 }
  0x38   :  { %s2993_s27 = sld [smem:[%s3230_s0 + %s2787_s22]]   ;;  %s2791_s22 = smov 40  }
  0x39   :  { %3258 = sst [smem:[#allocation39_spill]] %s2978_s4 }
  0x3a   :  { %s2998_s4 = sld [smem:[%s3230_s0 + %s2788_s28]]   ;;  %s2792_s28 = smov 41  }
  0x3b   :  { %3259 = sst [smem:[#allocation40_spill]] %s2983_s12 }
  0x3c   :  { %3260 = sst [smem:[#allocation41_spill]] %s2988_s30 }
  0x3d   :  { %s3003_s12 = sld [smem:[%s3230_s0 + %s2789_s7]]   ;;  %s2793_s7 = smov 42  }
  0x3e   :  { %3261 = sst [smem:[#allocation42_spill]] %s2993_s27 }
  0x3f   :  { %s3008_s30 = sld [smem:[%s3230_s0 + %s2790_s15]]  }
  0x40   :  { %3262 = sst [smem:[#allocation43_spill]] %s2998_s4 }
  0x41   :  { %s3013_s27 = sld [smem:[%s3230_s0 + %s2791_s22]]  }
  0x42   :  { %s3018_s4 = sld [smem:[%s3230_s0 + %s2792_s28]]  }
  0x43   :  { %3263 = sst [smem:[#allocation44_spill]] %s3003_s12 }
  0x44   :  { %s3023_s12 = sld [smem:[%s3230_s0 + %s2793_s7]]  }
  0x45   :  { %91 = vsyncpa [#allocation3], 0 }
  0x46   :  { %92 = vsyncpa [#allocation5], 0 }
  0x47   :  { %93 = vsyncpa [#allocation8], 0 }
  0x48   :  { %94 = vsyncpa [#allocation11], 0  ;;  %v169_v0 = vld [vmem:[%s2828_s17] sm:$0xff]  ;;  %v170_v1 = vld [vmem:[%s2828_s17 + $0x8] sm:$0xff]  ;;  %v2794_v3 = vmov 0.0|0.0   ;;  %v2795_v4 = vmov 0.0  }
  0x49   :  { %v171_v2 = vld [vmem:[%s2828_s17 + $0x10] sm:$0xff]  ;;  %2489 = vmatprep.subr.bf16.mxu1 %v2794_v3  ;;  %2353 = vmatprep.subr.mxu0 %v2795_v4  ;;  %v2490_v5 = vpack.c.bf16 %v170_v1, %v169_v0  ;;  %v167_v6 = vld [vmem:[%s2818_s9] sm:$0x3]  ;;  %vm172_vm0 = vcmask 64512   ;;  %vm2796_vm1 = vmmov 0  }
  0x4a   :  { %2354 = vmatpush3.msra.mxu0 %v171_v2  ;;  %2355 = vmatprep.mubr.msk.f32.mxu0 %vm2796_vm1, %v2795_v4 }
  0x4b   :  { %95 = vsyncpa [#allocation14], 0  ;;  %2491 = vmatpush3.bf16.msra.mxu1 %v2490_v5  ;;  %2356 = vmatmul.mubr.msk.f32.vlgmr.msra.gmra.mrb[0].mxu0 %vm172_vm0, %v167_v6  ;;  %v3035_v7 = vld [vmem:[%s2813_s5] sm:$0x3]  ;;  %vm246_vm2 = vcmask 130048   ;;  %vm341_vm3 = vcmask 1043456  }
  0x4c   :  { %2362 = vmatprep.mubr.msk.f32.mxu1 %vm2796_vm1, %v2795_v4  ;;  %2365 = vmatprep.subr.mxu0 %v2795_v4  ;;  %v329_v8 = vld [vmem:[%s2838_s25] sm:$0xf]  ;;  %v417_v9 = vld [vmem:[%s2848_s3 + $0x10] sm:$0xff]  ;;  %v416_v18 = vld [vmem:[%s2848_s3 + $0x8] sm:$0xff]  ;;  %vm337_vm4 = vcmask 31744   ;;  %vm2088_vm5 = vcmask 25600  }
  0x4d   :  { %2367 = vmatprep.mubr.msk.f32.mxu0 %vm2796_vm1, %v2795_v4  ;;  %2370 = vmatprep.subr.mxu1 %v2795_v4  ;;  %v168_v10 = vld [vmem:[%s2823_s13] sm:$0x3]  ;;  %v656_v22 = vld [vmem:[%s2868_s24 + $0x10] sm:$0xf]  ;;  %v655_v35 = vld [vmem:[%s2868_s24 + $0x8] sm:$0xff]  ;;  %s3264_s0 = sld [smem:[#allocation20_spill]] }
  0x4e   :  { %2363 = vmatmul.mubr.msk.f32.vlgmr.msra.gmra.mrb[0].mxu1 %vm246_vm2, %v3035_v7  ;;  %2366 = vmatpush3.msk.msra.mxu0 %vm341_vm3, %v329_v8  ;;  %v2251_v14 = vld [vmem:[%s2833_s21] ss:$0 sm:$0xff]  ;;  %v898_v39 = vld [vmem:[%s2888_s20 + $0x10] sm:$0xf]  ;;  %s3265_s5 = sld [smem:[#allocation25_spill]]  ;;  %s3266_s9 = sld [smem:[#allocation23_spill]] }
  0x4f   :  { %2372 = vmatprep.mubr.msk.f32.mxu1 %vm2796_vm1, %v2795_v4  ;;  %2492 = vmatprep.subr.bf16.mxu0 %v2794_v3  ;;  %v415_v17 = vld [vmem:[%s2848_s3] sm:$0xff]  ;;  %v897_v52 = vld [vmem:[%s2888_s20 + $0x8] sm:$0xff]  ;;  %s3267_s13 = sld [smem:[#allocation21_spill]]  ;;  %s3268_s17 = sld [smem:[#allocation22_spill]]  ;;  %vm2093_vm6 = vcmask 58368  }
  0x50   :  { %2371 = vmatpush3.msra.mxu1 %v417_v9  ;;  %v2493_v20 = vpack.c.bf16 %v416_v18, %v415_v17  ;;  %v570_v25 = vld [vmem:[%s2858_s14] sm:$0xf]  ;;  %s3269_s21 = sld [smem:[#allocation29_spill]]  ;;  %s3270_s25 = sld [smem:[#allocation27_spill]] }
  0x51   :  { %2382 = vmatprep.subr.mxu1 %v2795_v4  ;;  %v2252_v26 = vld [vmem:[%s2843_s29] ss:$0 sm:$0xff]  ;;  %s3271_s29 = sld [smem:[#allocation24_spill]]  ;;  %s3272_s3 = sld [smem:[#allocation26_spill]] }
  0x52   :  { %2373 = vmatmul.mubr.msk.f32.vlgmr.msra.gmra.mrb[2].mxu1 %vm172_vm0, %v168_v10  ;;  %v2257_v31 = vld [vmem:[%s2853_s8] ss:$0 sm:$0xff]  ;;  %s3273_s8 = sld [smem:[#allocation33_spill]]  ;;  %s3274_s14 = sld [smem:[#allocation31_spill]] }
  0x53   :  { %2384 = vmatprep.mubr.msk.f32.mxu1 %vm2796_vm1, %v2795_v4  ;;  %2383 = vmatpush3.msk.msra.mxu1 %vm341_vm3, %v570_v25  ;;  %v654_v34 = vld [vmem:[%s2868_s24] sm:$0xff]  ;;  %s3276_s24 = sld [smem:[#allocation30_spill]]  ;;  %s3279_s15 = sld [smem:[#allocation32_spill]] }
  0x54   :  { %2495 = vmatprep.subr.bf16.mxu1 %v2794_v3  ;;  %v2496_v37 = vpack.c.bf16 %v655_v35, %v654_v34  ;;  %v812_v40 = vld [vmem:[%s2878_s6] sm:$0xf]  ;;  %v1140_v56 = vld [vmem:[%s3265_s5 + $0x10] sm:$0xf]  ;;  %v1139_v8 = vld [vmem:[%s3265_s5 + $0x8] sm:$0xff]  ;;  %s3277_s6 = sld [smem:[#allocation37_spill]] }
  0x55   :  { %v2258_v43 = vld [vmem:[%s2863_s19] ss:$0 sm:$0xff]  ;;  %s3275_s19 = sld [smem:[#allocation28_spill]]  ;;  %s3280_s16 = sld [smem:[#allocation34_spill]] }
  0x56   :  { %v2264_v48 = vld [vmem:[%s3264_s0] ss:$0 sm:$0xff]  ;;  %v1378_v25 = vld [vmem:[%s3269_s21 + $0x8] sm:$0xff]  ;;  %s3281_s18 = sld [smem:[#allocation39_spill]]  ;;  %s3282_s22 = sld [smem:[#allocation36_spill]] }
  0x57   :  { %v896_v51 = vld [vmem:[%s2888_s20] sm:$0xff]  ;;  %s3278_s20 = sld [smem:[#allocation35_spill]]  ;;  %s3283_s23 = sld [smem:[#allocation38_spill]] }
  0x58   :  { %v2499_v54 = vpack.c.bf16 %v897_v52, %v896_v51  ;;  %v1054_v57 = vld [vmem:[%s3266_s9] sm:$0xf]  ;;  %s2797_s26 = smov [#allocation4]   ;;  %s2798_s1 = smov [#allocation7]  }
  0x59   :  { %v2265_v60 = vld [vmem:[%s3267_s13] ss:$0 sm:$0xff]  ;;  %s2114_s28 = sshll.u32 %s2797_s26, 4  ;;  %s2134_s2 = sshll.u32 %s2798_s1, 4  ;;  %s2115_s28 = int_to_ptr.vmem [resolvable:$true] %s2114_s28  ;;  %s2135_s2 = int_to_ptr.vmem [resolvable:$true] %s2134_s2 }
  0x5a   :  { %v2271_v1 = vld [vmem:[%s3268_s17] ss:$0 sm:$0xff]  ;;  %s2566_s7 = scalar_lea.vmem %s2115_s28, 32  ;;  %p2571_p1 = scmp.lt.s32.totalorder %s2115_s28, %s2115_s28 }
  0x5b   :  { %v1138_v6 = vld [vmem:[%s3265_s5] sm:$0xff]  ;;  %p2567_p0 = scmp.ne.s32.totalorder %s2115_s28, %s2566_s7  ;;  %p2572_p2 = scmp.lt.s32.totalorder %s2566_s7, %s2566_s7 }
  0x5c   :  { %v2502_v10 = vpack.c.bf16 %v1139_v8, %v1138_v6 }
  0x5d   :  { %p2573_p3 = por %p2572_p2, %p2571_p1 }
  0x5f   :  { %p2574_p4 = pnand %p2573_p3, %p2567_p0 }
 0x11e   :  { %v242_v11 = vpop.f32.mrb[0].mxu0 }
 0x11f   :  { %v2357_v12 = vpop.f32.mrb[1].mxu0 }
 0x120   :  { %v1379_v12 = vld [vmem:[%s3269_s21 + $0x10] sm:$0xf] }
 0x121   :  { %v316_v13 = vpop.f32.mrb[0].mxu1 }
 0x122   :  { %v317_v15 = vadd.f32 %v316_v13, %v242_v11  ;;  %v2364_v16 = vpop.f32.mrb[1].mxu1  ;;  %v1296_v13 = vld [vmem:[%s3270_s25] sm:$0xff] }
 0x123   :  { %v2272_v16 = vld [vmem:[%s3271_s29] ss:$0 sm:$0xff] }
 0x124   :  { %v327_v19 = vadd.f32 %v2251_v14, %v317_v15 }
 0x125   :  { %v487_v23 = vpop.f32.mrb[2].mxu1 }
 0x126   :  { %v328_v21 = vmax.f32 %v327_v19, 0.0  ;;  %v2374_v24 = vpop.f32.mrb[3].mxu1 }
 0x127   :  { %v1377_v24 = vld [vmem:[%s3269_s21] sm:$0xff] }
 0x128   :  { %2368 = vmatmul.mubr.msk.f32.vlgmr.msra.gmra.mrb[2].mxu0 %vm337_vm4, %v328_v21  ;;  %v2278_v21 = vld [vmem:[%s3272_s3] ss:$0 sm:$0xff] }
 0x129   :  { %2494 = vmatpush3.bf16.msra.mxu0 %v2493_v20  ;;  %2379 = vmatprep.mubr.msk.f32.mxu0 %vm2796_vm1, %v2795_v4 }
 0x12a   :  { %2387 = vmatprep.subr.mxu0 %v2795_v4 }
 0x12c   :  { %2380 = vmatmul.mubr.msk.f32.vlgmr.msra.gmra.mrb[4].mxu0 %vm246_vm2, %v3035_v7 }
 0x12d   :  { %2389 = vmatprep.mubr.msk.f32.mxu0 %vm2796_vm1, %v2795_v4  ;;  %2388 = vmatpush3.msk.msra.mxu0 %vm341_vm3, %v656_v22 }
 0x12e   :  { %2399 = vmatprep.subr.mxu0 %v2795_v4 }
 0x1fb   :  { %v411_v27 = vpop.f32.mrb[2].mxu0 }
 0x1fc   :  { %v412_v28 = vadd.f32 %v2252_v26, %v411_v27  ;;  %v2369_v29 = vpop.f32.mrb[3].mxu0  ;;  %v2505_v27 = vpack.c.bf16 %v1378_v25, %v1377_v24 }
 0x1fd   :  { %v1618_v29 = vld [vmem:[%s3273_s8 + $0x10] sm:$0xff] }
 0x1fe   :  { %2390 = vmatmul.mubr.msk.f32.vlgmr.msra.gmra.mrb[6].mxu0 %vm337_vm4, %v412_v28  ;;  %2089 = vst.msk [vmem:[#allocation2] sm:$0x3] %vm2088_vm5, %v412_v28 }
 0x1ff   :  { %v557_v30 = vpop.f32.mrb[4].mxu0  ;;  %2401 = vmatprep.mubr.msk.f32.mxu0 %vm2796_vm1, %v2795_v4  ;;  %2400 = vmatpush3.msk.msra.mxu0 %vm341_vm3, %v812_v40 }
 0x200   :  { %v558_v32 = vadd.f32 %v557_v30, %v487_v23  ;;  %v2381_v33 = vpop.f32.mrb[5].mxu0  ;;  %2498 = vmatprep.subr.bf16.mxu0 %v2794_v3  ;;  %v1535_v30 = vld [vmem:[%s3274_s14] sm:$0xff] }
 0x201   :  { %v2279_v33 = vld [vmem:[%s3275_s19] ss:$0 sm:$0xff] }
 0x202   :  { %v568_v36 = vadd.f32 %v2257_v31, %v558_v32 }
 0x204   :  { %v569_v38 = vmax.f32 %v568_v36, 0.0 }
 0x206   :  { %2385 = vmatmul.mubr.msk.f32.vlgmr.msra.gmra.mrb[4].mxu1 %vm337_vm4, %v569_v38  ;;  %v2284_v38 = vld [vmem:[%s3276_s24] ss:$0 sm:$0xff] }
 0x207   :  { %2497 = vmatpush3.bf16.msra.mxu1 %v2496_v37  ;;  %2396 = vmatprep.mubr.msk.f32.mxu1 %vm2796_vm1, %v2795_v4 }
 0x208   :  { %2404 = vmatprep.subr.mxu1 %v2795_v4 }
 0x20a   :  { %2397 = vmatmul.mubr.msk.f32.vlgmr.msra.gmra.mrb[6].mxu1 %vm246_vm2, %v3035_v7 }
 0x20b   :  { %2406 = vmatprep.mubr.msk.f32.mxu1 %vm2796_vm1, %v2795_v4  ;;  %2405 = vmatpush3.msk.msra.mxu1 %vm341_vm3, %v898_v39 }
 0x20c   :  { %2416 = vmatprep.subr.mxu1 %v2795_v4 }
 0x2d1   :  { %v729_v41 = vpop.f32.mrb[6].mxu0 }
 0x2d2   :  { %v2391_v42 = vpop.f32.mrb[7].mxu0 }
 0x2d3   :  { %v1617_v42 = vld [vmem:[%s3273_s8 + $0x8] sm:$0xff] }
 0x2d9   :  { %v650_v44 = vpop.f32.mrb[4].mxu1 }
 0x2da   :  { %v651_v45 = vadd.f32 %v2258_v43, %v650_v44  ;;  %v2386_v46 = vpop.f32.mrb[5].mxu1 }
 0x2db   :  { %v1854_v46 = vld [vmem:[%s3277_s6 + $0x10] sm:$0xff] }
 0x2dc   :  { %2407 = vmatmul.mubr.msk.f32.vlgmr.msra.gmra.mrb[8].mxu1 %vm337_vm4, %v651_v45  ;;  %2090 = vst.msk [vmem:[#allocation4] sm:$0x3] %vm2088_vm5, %v651_v45 }
 0x2dd   :  { %v799_v47 = vpop.f32.mrb[6].mxu1  ;;  %2418 = vmatprep.mubr.msk.f32.mxu1 %vm2796_vm1, %v2795_v4  ;;  %2417 = vmatpush3.msk.msra.mxu1 %vm341_vm3, %v1054_v57 }
 0x2de   :  { %v800_v49 = vadd.f32 %v799_v47, %v729_v41  ;;  %v2398_v50 = vpop.f32.mrb[7].mxu1  ;;  %2501 = vmatprep.subr.bf16.mxu1 %v2794_v3  ;;  %v1616_v41 = vld [vmem:[%s3273_s8] sm:$0xff] }
 0x2df   :  { %v2508_v44 = vpack.c.bf16 %v1617_v42, %v1616_v41  ;;  %v1771_v47 = vld [vmem:[%s3278_s20] sm:$0xff] }
 0x2e0   :  { %v810_v53 = vadd.f32 %v2264_v48, %v800_v49  ;;  %v2285_v50 = vld [vmem:[%s3279_s15] ss:$0 sm:$0xff] }
 0x2e2   :  { %v811_v55 = vmax.f32 %v810_v53, 0.0 }
 0x2e4   :  { %2402 = vmatmul.mubr.msk.f32.vlgmr.msra.gmra.mrb[8].mxu0 %vm337_vm4, %v811_v55  ;;  %v2289_v55 = vld [vmem:[%s3280_s16] ss:$0 sm:$0xff] }
 0x2e5   :  { %2500 = vmatpush3.bf16.msra.mxu0 %v2499_v54  ;;  %2413 = vmatprep.mubr.msk.f32.mxu0 %vm2796_vm1, %v2795_v4 }
 0x2e6   :  { %2421 = vmatprep.subr.mxu0 %v2795_v4 }
 0x2e8   :  { %2414 = vmatmul.mubr.msk.f32.vlgmr.msra.gmra.mrb[10].mxu0 %vm246_vm2, %v3035_v7 }
 0x2e9   :  { %2423 = vmatprep.mubr.msk.f32.mxu0 %vm2796_vm1, %v2795_v4  ;;  %2422 = vmatpush3.msk.msra.mxu0 %vm341_vm3, %v1140_v56 }
 0x2ea   :  { %2433 = vmatprep.subr.mxu0 %v2795_v4 }
 0x3af   :  { %v971_v58 = vpop.f32.mrb[8].mxu1 }
 0x3b0   :  { %v2408_v59 = vpop.f32.mrb[9].mxu1 }
 0x3b7   :  { %v892_v61 = vpop.f32.mrb[8].mxu0 }
 0x3b8   :  { %v893_v62 = vadd.f32 %v2265_v60, %v892_v61  ;;  %v2403_v63 = vpop.f32.mrb[9].mxu0 }
 0x3ba   :  { %2424 = vmatmul.mubr.msk.f32.vlgmr.msra.gmra.mrb[12].mxu0 %vm337_vm4, %v893_v62  ;;  %2091 = vst.msk [vmem:[#allocation6] sm:$0x3] %vm2088_vm5, %v893_v62  ;;  %v2007_v62 = vld [vmem:[%s3281_s18] sm:$0xff] }
 0x3bb   :  { %v1041_v0 = vpop.f32.mrb[10].mxu0  ;;  %2435 = vmatprep.mubr.msk.f32.mxu0 %vm2796_vm1, %v2795_v4  ;;  %2434 = vmatpush3.msra.mxu0 %v1296_v13 }
 0x3bc   :  { %v1042_v2 = vadd.f32 %v1041_v0, %v971_v58  ;;  %v2415_v5 = vpop.f32.mrb[11].mxu0  ;;  %2504 = vmatprep.subr.bf16.mxu0 %v2794_v3  ;;  %v1853_v58 = vld [vmem:[%s3277_s6 + $0x8] sm:$0xff] }
 0x3be   :  { %v1052_v9 = vadd.f32 %v2271_v1, %v1042_v2  ;;  %v2290_v1 = vld [vmem:[%s3282_s22] ss:$0 sm:$0xff] }
 0x3c0   :  { %v1053_v11 = vmax.f32 %v1052_v9, 0.0  ;;  %v2294_v9 = vld [vmem:[%s3283_s23] ss:$0 sm:$0xff] }
 0x3c2   :  { %2419 = vmatmul.mubr.msk.f32.vlgmr.msra.gmra.mrb[10].mxu1 %vm337_vm4, %v1053_v11 }
 0x3c3   :  { %2503 = vmatpush3.bf16.msra.mxu1 %v2502_v10  ;;  %2430 = vmatprep.mubr.msk.f32.mxu1 %vm2796_vm1, %v2795_v4 }
 0x3c4   :  { %2438 = vmatprep.subr.mxu1 %v2795_v4 }
 0x3c6   :  { %2431 = vmatmul.mubr.msk.f32.vlgmr.msra.gmra.mrb[12].mxu1 %vm246_vm2, %v3035_v7 }
 0x3c7   :  { %2440 = vmatprep.mubr.msk.f32.mxu1 %vm2796_vm1, %v2795_v4  ;;  %2439 = vmatpush3.msk.msra.mxu1 %vm341_vm3, %v1379_v12 }
 0x3c8   :  { %2450 = vmatprep.subr.mxu1 %v2795_v4 }
 0x48d   :  { %v1213_v14 = vpop.f32.mrb[12].mxu0 }
 0x48e   :  { %v2425_v15 = vpop.f32.mrb[13].mxu0 }
 0x495   :  { %v1134_v17 = vpop.f32.mrb[10].mxu1 }
 0x496   :  { %v1135_v18 = vadd.f32 %v2272_v16, %v1134_v17  ;;  %v2420_v19 = vpop.f32.mrb[11].mxu1 }
 0x498   :  { %2441 = vmatmul.mubr.msk.f32.vlgmr.msra.gmra.mrb[14].mxu1 %vm337_vm4, %v1135_v18  ;;  %2092 = vst.msk [vmem:[#allocation7] sm:$0x3] %vm2088_vm5, %v1135_v18 }
 0x499   :  { %v1283_v20 = vpop.f32.mrb[12].mxu1  ;;  %2452 = vmatprep.mubr.msk.f32.mxu1 %vm2796_vm1, %v2795_v4  ;;  %2451 = vmatpush3.msra.mxu1 %v1535_v30 }
 0x49a   :  { %v1284_v22 = vadd.f32 %v1283_v20, %v1213_v14  ;;  %v2432_v23 = vpop.f32.mrb[13].mxu1  ;;  %2507 = vmatprep.subr.bf16.mxu1 %v2794_v3 }
 0x49c   :  { %v1294_v26 = vadd.f32 %v2278_v21, %v1284_v22 }
 0x49e   :  { %v1295_v28 = vmax.f32 %v1294_v26, 0.0 }
 0x4a0   :  { %2436 = vmatmul.mubr.msk.f32.vlgmr.msra.gmra.mrb[14].mxu0 %vm172_vm0, %v1295_v28 }
 0x4a1   :  { %2506 = vmatpush3.bf16.msra.mxu0 %v2505_v27  ;;  %2447 = vmatprep.mubr.msk.f32.mxu0 %vm2796_vm1, %v2795_v4 }
 0x4a2   :  { %2455 = vmatprep.subr.mxu0 %v2795_v4 }
 0x4a4   :  { %2448 = vmatmul.mubr.msk.f32.vlgmr.msra.gmra.mrb[16].mxu0 %vm246_vm2, %v3035_v7 }
 0x4a5   :  { %2457 = vmatprep.mubr.msk.f32.mxu0 %vm2796_vm1, %v2795_v4  ;;  %2456 = vmatpush3.msra.mxu0 %v1618_v29 }
 0x4a6   :  { %2467 = vmatprep.subr.mxu0 %v2795_v4 }
 0x56b   :  { %v1452_v31 = vpop.f32.mrb[14].mxu1 }
 0x56c   :  { %v2442_v32 = vpop.f32.mrb[15].mxu1 }
 0x573   :  { %v1373_v34 = vpop.f32.mrb[14].mxu0 }
 0x574   :  { %v1374_v35 = vadd.f32 %v2279_v33, %v1373_v34  ;;  %v2437_v36 = vpop.f32.mrb[15].mxu0 }
 0x576   :  { %2458 = vmatmul.mubr.msk.f32.vlgmr.msra.gmra.mrb[18].mxu0 %vm172_vm0, %v1374_v35  ;;  %2094 = vst.msk [vmem:[#allocation9] sm:$0x3] %vm2093_vm6, %v1374_v35 }
 0x577   :  { %v1522_v37 = vpop.f32.mrb[16].mxu0  ;;  %2469 = vmatprep.mubr.msk.f32.mxu0 %vm2796_vm1, %v2795_v4  ;;  %2468 = vmatpush3.msra.mxu0 %v1771_v47 }
 0x578   :  { %v1523_v39 = vadd.f32 %v1522_v37, %v1452_v31  ;;  %v2449_v40 = vpop.f32.mrb[17].mxu0  ;;  %2510 = vmatprep.subr.bf16.mxu0 %v2794_v3  ;;  %v1852_v3 = vld [vmem:[%s3277_s6] sm:$0xff] }
 0x579   :  { %v2511_v60 = vpack.c.bf16 %v1853_v58, %v1852_v3 }
 0x57a   :  { %v1533_v43 = vadd.f32 %v2284_v38, %v1523_v39 }
 0x57c   :  { %v1534_v45 = vmax.f32 %v1533_v43, 0.0 }
 0x57e   :  { %2453 = vmatmul.mubr.msk.f32.vlgmr.msra.gmra.mrb[16].mxu1 %vm172_vm0, %v1534_v45 }
 0x57f   :  { %2509 = vmatpush3.bf16.msra.mxu1 %v2508_v44  ;;  %2464 = vmatprep.mubr.msk.f32.mxu1 %vm2796_vm1, %v2795_v4 }
 0x580   :  { %2472 = vmatprep.subr.mxu1 %v2795_v4 }
 0x582   :  { %2465 = vmatmul.mubr.msk.f32.vlgmr.msra.gmra.mrb[18].mxu1 %vm246_vm2, %v3035_v7 }
 0x583   :  { %2474 = vmatprep.mubr.msk.f32.mxu1 %vm2796_vm1, %v2795_v4  ;;  %2473 = vmatpush3.msra.mxu1 %v1854_v46 }
 0x584   :  { %2484 = vmatprep.subr.mxu1 %v2795_v4 }
 0x649   :  { %v1688_v48 = vpop.f32.mrb[18].mxu0 }
 0x64a   :  { %v2459_v49 = vpop.f32.mrb[19].mxu0 }
 0x651   :  { %v1612_v51 = vpop.f32.mrb[16].mxu1 }
 0x652   :  { %v1613_v52 = vadd.f32 %v2285_v50, %v1612_v51  ;;  %v2454_v53 = vpop.f32.mrb[17].mxu1 }
 0x654   :  { %2475 = vmatmul.mubr.msk.f32.vlgmr.msra.gmra.mrb[20].mxu1 %vm172_vm0, %v1613_v52  ;;  %2095 = vst.msk [vmem:[#allocation10] sm:$0x3] %vm2093_vm6, %v1613_v52 }
 0x655   :  { %v1758_v54 = vpop.f32.mrb[18].mxu1  ;;  %2486 = vmatprep.mubr.msk.f32.mxu1 %vm2796_vm1, %v2795_v4  ;;  %2485 = vmatpush3.msra.mxu1 %v2007_v62 }
 0x656   :  { %v1759_v56 = vadd.f32 %v1758_v54, %v1688_v48  ;;  %v2466_v57 = vpop.f32.mrb[19].mxu1 }
 0x658   :  { %v1769_v59 = vadd.f32 %v2289_v55, %v1759_v56 }
 0x65a   :  { %v1770_v61 = vmax.f32 %v1769_v59, 0.0 }
 0x65c   :  { %2470 = vmatmul.mubr.msk.f32.vlgmr.msra.gmra.mrb[20].mxu0 %vm172_vm0, %v1770_v61 }
 0x65d   :  { %2512 = vmatpush3.bf16.msra.mxu0 %v2511_v60  ;;  %2481 = vmatprep.mubr.msk.f32.mxu0 %vm2796_vm1, %v2795_v4 }
 0x660   :  { %2482 = vmatmul.mubr.msk.f32.vlgmr.msra.gmra.mrb[22].mxu0 %vm246_vm2, %v3035_v7 }
 0x727   :  { %v1924_v63 = vpop.f32.mrb[20].mxu1 }
 0x728   :  { %v2476_v0 = vpop.f32.mrb[21].mxu1 }
 0x72f   :  { %v1848_v2 = vpop.f32.mrb[20].mxu0 }
 0x730   :  { %v1849_v5 = vadd.f32 %v2290_v1, %v1848_v2  ;;  %v2471_v6 = vpop.f32.mrb[21].mxu0 }
 0x732   :  { %2096 = vst.msk [vmem:[#allocation12] sm:$0x3] %vm2093_vm6, %v1849_v5 }
 0x733   :  { %v1994_v8 = vpop.f32.mrb[22].mxu0 }
 0x734   :  { %v1995_v10 = vadd.f32 %v1994_v8, %v1924_v63  ;;  %v2483_v11 = vpop.f32.mrb[23].mxu0 }
 0x736   :  { %v2005_v12 = vadd.f32 %v2294_v9, %v1995_v10 }
 0x738   :  { %v2006_v13 = vmax.f32 %v2005_v12, 0.0 }
 0x73a   :  { %2487 = vmatmul.mubr.msk.f32.vlgmr.msra.gmra.mrb[22].mxu1 %vm172_vm0, %v2006_v13 }
 0x73b   :  { %2577 = shalt.err (!%p2574_p4)
}
 0x73c   :  { %s3284_s10 = sld [smem:[#allocation42_spill]] }
 0x742   :  { %s2578_s11 = scalar_lea.hbm %s3284_s10, 32 }
 0x743   :  { %p2579_p5 = scmp.ne.s32.totalorder %s3284_s10, %s2578_s11  ;;  %p2582_p6 = scmp.lt.u32.totalorder %s2578_s11, %s3284_s10 }
 0x745   :  { %p2584_p7 = pnand %p2582_p6, %p2579_p5 }
 0x747   :  { %2587 = shalt.err (!%p2584_p7)
}
 0x748   :  { %2117 = dma.vmem_to_hbm [thread:$0]  %s2115_s28, 32, %s3284_s10, [#allocation5]  }
 0x749   :  { %s2588_s0 = scalar_lea.vmem %s2135_s2, 32  ;;  %p2593_p9 = scmp.lt.s32.totalorder %s2135_s2, %s2135_s2 }
 0x74a   :  { %p2589_p8 = scmp.ne.s32.totalorder %s2135_s2, %s2588_s0  ;;  %p2594_p10 = scmp.lt.s32.totalorder %s2588_s0, %s2588_s0 }
 0x74c   :  { %p2595_p11 = por %p2594_p10, %p2593_p9 }
 0x74e   :  { %p2596_p12 = pnand %p2595_p11, %p2589_p8 }
 0x750   :  { %2599 = shalt.err (!%p2596_p12)
}
 0x751   :  { %s3285_s5 = sld [smem:[#allocation44_spill]] }
 0x757   :  { %s2600_s9 = scalar_lea.hbm %s3285_s5, 32 }
 0x758   :  { %p2601_p13 = scmp.ne.s32.totalorder %s3285_s5, %s2600_s9  ;;  %p2604_p0 = scmp.lt.u32.totalorder %s2600_s9, %s3285_s5 }
 0x75a   :  { %p2606_p1 = pnand %p2604_p0, %p2601_p13 }
 0x75c   :  { %2609 = shalt.err (!%p2606_p1)
}
 0x75d   :  { %2137 = dma.vmem_to_hbm [thread:$0]  %s2135_s2, 32, %s3285_s5, [#allocation8]  }
 0x75e   :  { %s2799_s13 = smov [#allocation10]   ;;  %s2800_s21 = smov [#allocation2]  }
 0x75f   :  { %s2154_s17 = sshll.u32 %s2799_s13, 4  ;;  %s2104_s25 = sshll.u32 %s2800_s21, 4  ;;  %s2155_s17 = int_to_ptr.vmem [resolvable:$true] %s2154_s17  ;;  %s2105_s25 = int_to_ptr.vmem [resolvable:$true] %s2104_s25 }
 0x760   :  { %s2610_s29 = scalar_lea.vmem %s2155_s17, 32  ;;  %p2615_p3 = scmp.lt.s32.totalorder %s2155_s17, %s2155_s17 }
 0x761   :  { %p2611_p2 = scmp.ne.s32.totalorder %s2155_s17, %s2610_s29  ;;  %p2616_p4 = scmp.lt.s32.totalorder %s2610_s29, %s2610_s29 }
 0x763   :  { %p2617_p5 = por %p2616_p4, %p2615_p3 }
 0x765   :  { %p2618_p6 = pnand %p2617_p5, %p2611_p2 }
 0x767   :  { %2621 = shalt.err (!%p2618_p6)
}
 0x768   :  { %s2622_s3 = scalar_lea.hbm %s3013_s27, 32 }
 0x769   :  { %p2623_p7 = scmp.ne.s32.totalorder %s3013_s27, %s2622_s3  ;;  %p2626_p8 = scmp.lt.u32.totalorder %s2622_s3, %s3013_s27 }
 0x76b   :  { %p2628_p9 = pnand %p2626_p8, %p2623_p7 }
 0x76d   :  { %2631 = shalt.err (!%p2628_p9)
}
 0x76e   :  { %2157 = dma.vmem_to_hbm [thread:$0]  %s2155_s17, 32, %s3013_s27, [#allocation11]  }
 0x76f   :  { %s2632_s8 = scalar_lea.vmem %s2105_s25, 32  ;;  %p2637_p11 = scmp.lt.s32.totalorder %s2105_s25, %s2105_s25 }
 0x770   :  { %p2633_p10 = scmp.ne.s32.totalorder %s2105_s25, %s2632_s8  ;;  %p2638_p12 = scmp.lt.s32.totalorder %s2632_s8, %s2632_s8 }
 0x772   :  { %p2639_p13 = por %p2638_p12, %p2637_p11 }
 0x774   :  { %p2640_p0 = pnand %p2639_p13, %p2633_p10 }
 0x776   :  { %2643 = shalt.err (!%p2640_p0)
}
 0x777   :  { %s3286_s14 = sld [smem:[#allocation41_spill]] }
 0x77d   :  { %s2644_s19 = scalar_lea.hbm %s3286_s14, 32 }
 0x77e   :  { %p2645_p1 = scmp.ne.s32.totalorder %s3286_s14, %s2644_s19  ;;  %p2648_p2 = scmp.lt.u32.totalorder %s2644_s19, %s3286_s14 }
 0x780   :  { %p2650_p3 = pnand %p2648_p2, %p2645_p1 }
 0x782   :  { %2653 = shalt.err (!%p2650_p3)
}
 0x783   :  { %2107 = dma.vmem_to_hbm [thread:$0]  %s2105_s25, 32, %s3286_s14, [#allocation3]  }
 0x784   :  { %s2801_s24 = smov [#allocation6]   ;;  %s2802_s27 = smov [#allocation9]  }
 0x785   :  { %s2124_s6 = sshll.u32 %s2801_s24, 4  ;;  %s2144_s20 = sshll.u32 %s2802_s27, 4  ;;  %s2125_s6 = int_to_ptr.vmem [resolvable:$true] %s2124_s6  ;;  %s2145_s20 = int_to_ptr.vmem [resolvable:$true] %s2144_s20 }
 0x786   :  { %s2654_s15 = scalar_lea.vmem %s2125_s6, 32  ;;  %p2659_p5 = scmp.lt.s32.totalorder %s2125_s6, %s2125_s6 }
 0x787   :  { %p2655_p4 = scmp.ne.s32.totalorder %s2125_s6, %s2654_s15  ;;  %p2660_p6 = scmp.lt.s32.totalorder %s2654_s15, %s2654_s15 }
 0x789   :  { %p2661_p7 = por %p2660_p6, %p2659_p5 }
 0x78b   :  { %p2662_p8 = pnand %p2661_p7, %p2655_p4 }
 0x78d   :  { %2665 = shalt.err (!%p2662_p8)
}
 0x78e   :  { %s3287_s16 = sld [smem:[#allocation43_spill]] }
 0x794   :  { %s2666_s18 = scalar_lea.hbm %s3287_s16, 32 }
 0x795   :  { %p2667_p9 = scmp.ne.s32.totalorder %s3287_s16, %s2666_s18  ;;  %p2670_p10 = scmp.lt.u32.totalorder %s2666_s18, %s3287_s16 }
 0x797   :  { %p2672_p11 = pnand %p2670_p10, %p2667_p9 }
 0x799   :  { %2675 = shalt.err (!%p2672_p11)
}
 0x79a   :  { %2127 = dma.vmem_to_hbm [thread:$0]  %s2125_s6, 32, %s3287_s16, [#allocation5]  }
 0x79b   :  { %s2676_s22 = scalar_lea.vmem %s2145_s20, 32  ;;  %p2681_p13 = scmp.lt.s32.totalorder %s2145_s20, %s2145_s20 }
 0x79c   :  { %p2677_p12 = scmp.ne.s32.totalorder %s2145_s20, %s2676_s22  ;;  %p2682_p0 = scmp.lt.s32.totalorder %s2676_s22, %s2676_s22 }
 0x79e   :  { %p2683_p1 = por %p2682_p0, %p2681_p13 }
 0x7a0   :  { %p2684_p2 = pnand %p2683_p1, %p2677_p12 }
 0x7a2   :  { %2687 = shalt.err (!%p2684_p2)
}
 0x7a3   :  { %s2688_s23 = scalar_lea.hbm %s3008_s30, 32 }
 0x7a4   :  { %p2689_p3 = scmp.ne.s32.totalorder %s3008_s30, %s2688_s23  ;;  %p2692_p4 = scmp.lt.u32.totalorder %s2688_s23, %s3008_s30 }
 0x7a6   :  { %p2694_p5 = pnand %p2692_p4, %p2689_p3 }
 0x7a8   :  { %2697 = shalt.err (!%p2694_p5)
}
 0x7a9   :  { %2147 = dma.vmem_to_hbm [thread:$0]  %s2145_s20, 32, %s3008_s30, [#allocation8]  }
 0x7aa   :  { %s2803_s26 = smov [#allocation12]  }
 0x7ab   :  { %s2164_s28 = sshll.u32 %s2803_s26, 4  ;;  %s2165_s28 = int_to_ptr.vmem [resolvable:$true] %s2164_s28 }
 0x7ac   :  { %s2698_s1 = scalar_lea.vmem %s2165_s28, 32  ;;  %p2703_p7 = scmp.lt.s32.totalorder %s2165_s28, %s2165_s28 }
 0x7ad   :  { %p2699_p6 = scmp.ne.s32.totalorder %s2165_s28, %s2698_s1  ;;  %p2704_p8 = scmp.lt.s32.totalorder %s2698_s1, %s2698_s1 }
 0x7af   :  { %p2705_p9 = por %p2704_p8, %p2703_p7 }
 0x7b1   :  { %p2706_p10 = pnand %p2705_p9, %p2699_p6 }
 0x7b3   :  { %2709 = shalt.err (!%p2706_p10)
}
 0x7b4   :  { %s2710_s2 = scalar_lea.hbm %s3018_s4, 32 }
 0x7b5   :  { %p2711_p11 = scmp.ne.s32.totalorder %s3018_s4, %s2710_s2  ;;  %p2714_p12 = scmp.lt.u32.totalorder %s2710_s2, %s3018_s4 }
 0x7b7   :  { %p2716_p13 = pnand %p2714_p12, %p2711_p11 }
 0x7b9   :  { %2719 = shalt.err (!%p2716_p13)
}
 0x7ba   :  { %s3288_s30 = sld [smem:[#allocation40_spill]]  ;;  %s2804_s7 = smov [#allocation13]  }
 0x7bb   :  { %2167 = dma.vmem_to_hbm [thread:$0]  %s2165_s28, 32, %s3018_s4, [#allocation11]  }
 0x7bc   :  { %s2174_s10 = sshll.u32 %s2804_s7, 4  ;;  %s2175_s10 = int_to_ptr.vmem [resolvable:$true] %s2174_s10 }
 0x7bd   :  { %s2720_s11 = scalar_lea.vmem %s2175_s10, 32  ;;  %p2725_p1 = scmp.lt.s32.totalorder %s2175_s10, %s2175_s10 }
 0x7be   :  { %p2721_p0 = scmp.ne.s32.totalorder %s2175_s10, %s2720_s11  ;;  %p2726_p2 = scmp.lt.s32.totalorder %s2720_s11, %s2720_s11 }
 0x7c0   :  { %v2295_v4 = vld [vmem:[%s3288_s30] ss:$0 sm:$0xff]  ;;  %p2727_p3 = por %p2726_p2, %p2725_p1 }
 0x7c2   :  { %p2728_p4 = pnand %p2727_p3, %p2721_p0 }
 0x80d   :  { %v2084_v7 = vpop.f32.mrb[22].mxu1 }
 0x80e   :  { %v2085_v14 = vadd.f32 %v2295_v4, %v2084_v7  ;;  %v2488_v15 = vpop.f32.mrb[23].mxu1 }
 0x810   :  { %2097 = vst.msk [vmem:[#allocation13] sm:$0x3] %vm2093_vm6, %v2085_v14 }
 0x811   :  { %2731 = shalt.err (!%p2728_p4)
}
 0x812   :  { %s2732_s4 = scalar_lea.hbm %s3023_s12, 32 }
 0x813   :  { %p2733_p5 = scmp.ne.s32.totalorder %s3023_s12, %s2732_s4  ;;  %p2736_p6 = scmp.lt.u32.totalorder %s2732_s4, %s3023_s12 }
 0x815   :  { %p2738_p7 = pnand %p2736_p6, %p2733_p5 }
 0x817   :  { %2741 = shalt.err (!%p2738_p7)
}
 0x818   :  { %2177 = dma.vmem_to_hbm [thread:$0]  %s2175_s10, 32, %s3023_s12, [#allocation14]  }
 0x819   :  { %2742 = dma.done.wait [#allocation3], 32  }
 0x81a   :  { %2743 = vsyncadd [#allocation3], 4294967264 }
 0x81b   :  { %2744 = dma.done.wait [#allocation5], 64  }
 0x81c   :  { %2745 = vsyncadd [#allocation5], 4294967232 }
 0x81d   :  { %2746 = dma.done.wait [#allocation8], 64  }
 0x81e   :  { %2747 = vsyncadd [#allocation8], 4294967232 }
 0x81f   :  { %2748 = dma.done.wait [#allocation11], 64  }
 0x820   :  { %2749 = vsyncadd [#allocation11], 4294967232 }
 0x821   :  { %2750 = dma.done.wait [#allocation14], 32  }
 0x822   :  { %2751 = vsyncadd [#allocation14], 4294967264 }
 0x823   :  { %2202 = vsyncpa [#allocation3], 1 }
 0x824   :  { %2203 = vsyncpa [#allocation5], 1 }
 0x825   :  { %2204 = vsyncpa [#allocation8], 1 }
 0x826   :  { %2205 = vsyncpa [#allocation11], 1 }
 0x827   :  { %2206 = vsyncpa [#allocation14], 1 }

</bundles_post_ra>
